<compile_context>
chip_gen: v7x
topology: tpu7x:2x2x1
jax: 0.10.0
libtpu: 0.0.40
codegen_flags: <defaults>
</compile_context>

<pallas_src>
import jax
import jax.numpy as jnp
from jax.experimental import pallas as pl
from jax.experimental.pallas import tpu as pltpu


def _expand_kernel(x_ref, o_ref):
    # x_ref: (block_rows, 1)  -- one scalar per (batch, channel) row
    # o_ref: (block_rows, S)  -- S = target_height * target_width (lane-dense)
    # Lane splat goes through a cross-lane path, but that unit has huge slack
    # here (the kernel is store/DMA-bound), so nothing else to optimize.
    o_ref[...] = jnp.broadcast_to(x_ref[...], o_ref.shape)


def _divisors(n):
    small, large = [], []
    i = 1
    while i * i <= n:
        if n % i == 0:
            small.append(i)
            if i != n // i:
                large.append(n // i)
        i += 1
    return small + large[::-1]


def _pick_block_rows(rows, spatial, itemsize):
    """Largest divisor of `rows` giving a <=~2 MiB output block, preferring
    dtype-packed sublane multiples and grid_rows >= 2 (megacore on v7x)."""
    sublane_pack = {1: 32, 2: 16}.get(itemsize, 8)
    cap_bytes = 2 << 20  # ~2 MiB output block: overlaps fill with writeback
    row_bytes = spatial * itemsize
    divs = _divisors(rows)

    def ok(d, need_pack, need_split):
        if d * row_bytes > cap_bytes:
            return False
        if need_pack and d % sublane_pack != 0:
            return False
        if need_split and rows // d < 2:
            return False
        return True

    # Preference order: packed + split > packed > split > any divisor that fits.
    for need_pack, need_split in ((True, True), (True, False),
                                  (False, True), (False, False)):
        cands = [d for d in divs if ok(d, need_pack, need_split)]
        if cands:
            return max(cands)
    # Even a single row exceeds the cap (enormous spatial): one row per block.
    return 1


def reshape_capsule_output(capsule_output, target_height, target_width):
    """Pallas equivalent of ReshapeCapsuleOutput.forward."""
    b, num_capsules, capsule_dimension = capsule_output.shape
    target_channels = target_height * target_width
    if num_capsules * capsule_dimension != target_channels:
        raise ValueError(
            "Cannot reshape capsule output to the target size. Make sure "
            "num_capsules*capsule_dimension matches target_height*target_width.")

    spatial = target_height * target_width
    rows = b * target_channels
    itemsize = jnp.dtype(capsule_output.dtype).itemsize
    sublane_pack = {1: 32, 2: 16}.get(itemsize, 8)

    block_rows = _pick_block_rows(rows, spatial, itemsize)
    grid_rows = rows // block_rows

    # Real VMEM footprint: double-buffered output blocks + double-buffered
    # input column, which is lane-padded to 128 lanes (and sublane-padded)
    # inside VMEM regardless of its logical (block_rows, 1) shape.
    out_block_bytes = block_rows * spatial * itemsize
    padded_rows = ((block_rows + sublane_pack - 1) // sublane_pack) * sublane_pack
    in_block_bytes = padded_rows * 128 * itemsize
    budget = 2 * out_block_bytes + 2 * in_block_bytes
    vmem_limit = int(min(2 * budget + (4 << 20), 32 << 20))

    # Free, row-major metadata reshape: (B, NC, CD) -> (B*NC*CD, 1).
    x_col = capsule_output.reshape(rows, 1)

    out_slab = pl.pallas_call(
        _expand_kernel,
        out_shape=jax.ShapeDtypeStruct((rows, spatial), capsule_output.dtype),
        grid=(grid_rows,),
        in_specs=[pl.BlockSpec((block_rows, 1), lambda i: (i, 0))],
        out_specs=pl.BlockSpec((block_rows, spatial), lambda i: (i, 0)),
        compiler_params=pltpu.CompilerParams(
            dimension_semantics=("parallel",),
            vmem_limit_bytes=vmem_limit),
        cost_estimate=pl.CostEstimate(
            flops=0,
            transcendentals=0,
            bytes_accessed=rows * spatial * itemsize + rows * itemsize),
    )(x_col)

    # Free reshape back to the PyTorch (B, C, TH, TW) output layout.
    return out_slab.reshape(b, target_channels, target_height, target_width)


# ---------------- pure-JAX reference (mirrors the torch code) ----------------
def reference_forward(capsule_output, target_height, target_width):
    b, nc, cd = capsule_output.shape
    c = nc * cd
    return jnp.broadcast_to(
        capsule_output.reshape(b, c, 1, 1),
        (b, c, target_height, target_width))


if __name__ == "__main__":
    # Small shapes consistent with the module: NC * CD == TH * TW.
    B, NUM_CAPS, CAPS_DIM = 2, 8, 32
    TARGET_H = TARGET_W = 16            # 16 * 16 == 8 * 32 == 256

    key = jax.random.PRNGKey(0)
    x = jax.random.normal(key, (B, NUM_CAPS, CAPS_DIM), jnp.float32)

    fwd = jax.jit(lambda t: reshape_capsule_output(t, TARGET_H, TARGET_W))
    out = jax.block_until_ready(fwd(x))

    assert out.shape == (B, NUM_CAPS * CAPS_DIM, TARGET_H, TARGET_W)
    ref = reference_forward(x, TARGET_H, TARGET_W)
    err = float(jnp.max(jnp.abs(out - ref)))
    if not (err <= 1e-6):
        raise AssertionError(f"kernel output mismatch vs reference: {err}")
    print("KERNEL_OK")
</pallas_src>

<mosaic_0001>
module attributes {stable_mosaic.version = 11 : i64} {
  func.func @_expand_kernel(%arg0: i32, %arg1: memref<256x1xf32, #tpu.memory_space<vmem>>, %arg2: memref<256x256xf32, #tpu.memory_space<vmem>>) attributes {dimension_semantics = [#tpu.dimension_semantics<parallel>], iteration_bounds = array<i64: 2>, scalar_prefetch = 0 : i64, scratch_operands = 0 : i64, tpu.core_type = #tpu.core_type<tc>, window_params = [{transform_indices = @transform_0, window_bounds = array<i64: 256, 1>}, {transform_indices = @transform_1, window_bounds = array<i64: 256, 256>}]} {
    %c0 = arith.constant 0 : index
    %c0_0 = arith.constant 0 : index
    %0 = vector.load %arg1[%c0, %c0_0] : memref<256x1xf32, #tpu.memory_space<vmem>>, vector<256x1xf32>
    %1 = vector.shape_cast %0 : vector<256x1xf32> to vector<256x1xf32>
    %2 = vector.broadcast %1 : vector<256x1xf32> to vector<256x256xf32>
    %c0_1 = arith.constant 0 : index
    %c0_2 = arith.constant 0 : index
    %3 = vector.load %arg2[%c0_1, %c0_2] : memref<256x256xf32, #tpu.memory_space<vmem>>, vector<256x256xf32>
    tpu.vector_store %arg2[%c0_1, %c0_2], %2 {strides = array<i32>} : memref<256x256xf32, #tpu.memory_space<vmem>>, vector<256x256xf32>,
    return
  }
  func.func @transform_0(%arg0: i32) -> (i32, i32) {
    %c0_i32 = arith.constant 0 : i32
    %c0_i32_0 = arith.constant 0 : i32
    return %arg0, %c0_i32 : i32, i32
  }
  func.func @transform_1(%arg0: i32) -> (i32, i32) {
    %c0_i32 = arith.constant 0 : i32
    %c0_i32_0 = arith.constant 0 : i32
    return %arg0, %c0_i32 : i32, i32
  }
}

</mosaic_0001>

<bundles_post_ra>
// kernel: _lambda_.1
= control target key start
LH: loop header
LB: loop body
LE: loop exit
PB: predicated region body
PF: predicated region fallthrough
CT: control target
= control target key end

     0   :  { %s479_s6 = smov 0   ;;  %s600_s0 = inlined_call_operand.vmem [shape: f32[512,1], index: 0, kind: input, shape index: {}]   ;;  %s601_s1 = inlined_call_operand.vmem [shape: f32[512,256], index: 1, kind: output, shape index: {}]  }
   0x1 LB: > { %s436_s7 = sadd.s32 4294967295, %s466_s6   ;;  %p440_p0 = scmp.ge.s32.totalorder %s466_s6, 1  ;;  %s466_s6 = sphi %s479_s6, %s11_s6  }
   0x2   : > { %p88_p1 = scmp.lt.s32.totalorder %s466_s6, 3 }
   0x4   : > { %p89_p2 = pnand %p440_p0, %p88_p1 }
   0x5   : > { %s441_s8 = sshll.u32 (!%p89_p2), %s436_s7, 5  ;;  %v468_v0 = vmov (!%p89_p2), 0  }
   0x6   : > { %92 = sbr.rel (%p89_p2) target bundleno = 207 (0xcf), region = 24  ;;  %459 = vset.pattern.permute.xlu1 (!%p89_p2), %v468_v0  ;;  %458 = vset.pattern.permute.xlu0 (!%p89_p2), %v468_v0  ;;  %p110_p3 = scmp.lt.s32.totalorder (!%p89_p2), %s441_s8, 63 }
   0xd   : > { %s603_s8 = smov (!%p110_p3, %s441_s8), 63 }
   0xe   : > { %s442_s9 = sshll.u32 %s603_s8, 3  ;;  %s448_s13 = sshll.u32 %s603_s8, 4 }
   0xf   : > { %s493_s12 = scalar_lea.vmem %s600_s0, %s442_s9  ;;  %s531_s16 = scalar_lea.vmem %s601_s1, %s448_s13 }
  0x10   : > { %v124_v1 = vld [vmem:[%s493_s12 + $0x10] sm:$0xff]  ;;  %v122_v2 = vld [vmem:[%s493_s12] sm:$0xff]  ;;  %v125_v3 = vld [vmem:[%s493_s12 + $0x18] sm:$0xff] }
  0x11   : > { %166 = vperm.xlu1 %459, %v124_v1   ;;  %156 = vperm.xlu0 %458, %v122_v2   ;;  %v123_v4 = vld [vmem:[%s493_s12 + $0x8] sm:$0xff]  ;;  %v126_v6 = vld [vmem:[%s493_s12 + $0x20] sm:$0xff]  ;;  %v129_v7 = vld [vmem:[%s493_s12 + $0x38] sm:$0xff] }
  0x12   : > { %v127_v5 = vld [vmem:[%s493_s12 + $0x28] sm:$0xff]  ;;  %v128_v8 = vld [vmem:[%s493_s12 + $0x30] sm:$0xff]  ;;  %v130_v10 = vld [vmem:[%s493_s12 + $0x40] sm:$0xff] }
  0x13   : > { %v131_v9 = vld [vmem:[%s493_s12 + $0x48] sm:$0xff]  ;;  %v133_v11 = vld [vmem:[%s493_s12 + $0x58] sm:$0xff]  ;;  %v132_v12 = vld [vmem:[%s493_s12 + $0x50] sm:$0xff] }
  0x14   : > { %v135_v13 = vld [vmem:[%s493_s12 + $0x68] sm:$0xff]  ;;  %v134_v14 = vld [vmem:[%s493_s12 + $0x60] sm:$0xff]  ;;  %v137_v15 = vld [vmem:[%s493_s12 + $0x78] sm:$0xff] }
  0x15   : > { %171 = vperm.xlu1 %459, %v125_v3   ;;  %161 = vperm.xlu0 %458, %v123_v4   ;;  %v136_v16 = vld [vmem:[%s493_s12 + $0x70] sm:$0xff]  ;;  %v139_v17 = vld [vmem:[%s493_s12 + $0x88] sm:$0xff]  ;;  %v138_v18 = vld [vmem:[%s493_s12 + $0x80] sm:$0xff] }
  0x16   : > { %v141_v19 = vld [vmem:[%s493_s12 + $0x98] sm:$0xff]  ;;  %v140_v20 = vld [vmem:[%s493_s12 + $0x90] sm:$0xff]  ;;  %v143_v21 = vld [vmem:[%s493_s12 + $0xa8] sm:$0xff] }
  0x17   : > { %v142_v22 = vld [vmem:[%s493_s12 + $0xa0] sm:$0xff]  ;;  %v145_v23 = vld [vmem:[%s493_s12 + $0xb8] sm:$0xff]  ;;  %v144_v24 = vld [vmem:[%s493_s12 + $0xb0] sm:$0xff] }
  0x18   : > { %v147_v25 = vld [vmem:[%s493_s12 + $0xc8] sm:$0xff]  ;;  %v146_v26 = vld [vmem:[%s493_s12 + $0xc0] sm:$0xff]  ;;  %v149_v27 = vld [vmem:[%s493_s12 + $0xd8] sm:$0xff] }
  0x19   : > { %181 = vperm.xlu1 %459, %v127_v5   ;;  %176 = vperm.xlu0 %458, %v126_v6   ;;  %v148_v28 = vld [vmem:[%s493_s12 + $0xd0] sm:$0xff]  ;;  %v151_v29 = vld [vmem:[%s493_s12 + $0xe8] sm:$0xff]  ;;  %v150_v30 = vld [vmem:[%s493_s12 + $0xe0] sm:$0xff] }
  0x1a   : > { %v153_v31 = vld [vmem:[%s493_s12 + $0xf8] sm:$0xff]  ;;  %v152_v32 = vld [vmem:[%s493_s12 + $0xf0] sm:$0xff] }
  0x1d   : > { %191 = vperm.xlu1 %459, %v129_v7   ;;  %186 = vperm.xlu0 %458, %v128_v8  }
  0x21   : > { %201 = vperm.xlu1 %459, %v131_v9   ;;  %196 = vperm.xlu0 %458, %v130_v10  }
  0x25   : > { %211 = vperm.xlu1 %459, %v133_v11   ;;  %206 = vperm.xlu0 %458, %v132_v12  }
  0x29   : > { %221 = vperm.xlu1 %459, %v135_v13   ;;  %216 = vperm.xlu0 %458, %v134_v14  }
  0x2d   : > { %231 = vperm.xlu1 %459, %v137_v15   ;;  %226 = vperm.xlu0 %458, %v136_v16  }
  0x31   : > { %241 = vperm.xlu1 %459, %v139_v17   ;;  %236 = vperm.xlu0 %458, %v138_v18  }
  0x35   : > { %251 = vperm.xlu1 %459, %v141_v19   ;;  %246 = vperm.xlu0 %458, %v140_v20  }
  0x39   : > { %261 = vperm.xlu1 %459, %v143_v21   ;;  %256 = vperm.xlu0 %458, %v142_v22  }
  0x3d   : > { %271 = vperm.xlu1 %459, %v145_v23   ;;  %266 = vperm.xlu0 %458, %v144_v24  }
  0x41   : > { %281 = vperm.xlu1 %459, %v147_v25   ;;  %276 = vperm.xlu0 %458, %v146_v26  }
  0x45   : > { %291 = vperm.xlu1 %459, %v149_v27   ;;  %286 = vperm.xlu0 %458, %v148_v28  }
  0x49   : > { %301 = vperm.xlu1 %459, %v151_v29   ;;  %296 = vperm.xlu0 %458, %v150_v30  }
  0x4d   : > { %311 = vperm.xlu1 %459, %v153_v31   ;;  %306 = vperm.xlu0 %458, %v152_v32  }
  0x90   : > { %v167_v33 = vpop.permute.xlu1 %166  ;;  %v157_v34 = vpop.permute.xlu0 %156 }
  0x91   : > { %318 = vst [vmem:[%s531_s16 + $0x20] sm:$0xff] %v167_v33  ;;  %319 = vst [vmem:[%s531_s16 + $0x28] sm:$0xff] %v167_v33 }
  0x92   : > { %314 = vst [vmem:[%s531_s16] sm:$0xff] %v157_v34  ;;  %315 = vst [vmem:[%s531_s16 + $0x8] sm:$0xff] %v157_v34 }
  0x94   : > { %v172_v35 = vpop.permute.xlu1 %171  ;;  %v162_v36 = vpop.permute.xlu0 %161 }
  0x95   : > { %320 = vst [vmem:[%s531_s16 + $0x30] sm:$0xff] %v172_v35  ;;  %321 = vst [vmem:[%s531_s16 + $0x38] sm:$0xff] %v172_v35 }
  0x96   : > { %316 = vst [vmem:[%s531_s16 + $0x10] sm:$0xff] %v162_v36  ;;  %317 = vst [vmem:[%s531_s16 + $0x18] sm:$0xff] %v162_v36 }
  0x98   : > { %v182_v37 = vpop.permute.xlu1 %181  ;;  %v177_v38 = vpop.permute.xlu0 %176 }
  0x99   : > { %324 = vst [vmem:[%s531_s16 + $0x50] sm:$0xff] %v182_v37  ;;  %325 = vst [vmem:[%s531_s16 + $0x58] sm:$0xff] %v182_v37 }
  0x9a   : > { %322 = vst [vmem:[%s531_s16 + $0x40] sm:$0xff] %v177_v38  ;;  %323 = vst [vmem:[%s531_s16 + $0x48] sm:$0xff] %v177_v38 }
  0x9c   : > { %v192_v39 = vpop.permute.xlu1 %191  ;;  %v187_v40 = vpop.permute.xlu0 %186 }
  0x9d   : > { %328 = vst [vmem:[%s531_s16 + $0x70] sm:$0xff] %v192_v39  ;;  %329 = vst [vmem:[%s531_s16 + $0x78] sm:$0xff] %v192_v39 }
  0x9e   : > { %326 = vst [vmem:[%s531_s16 + $0x60] sm:$0xff] %v187_v40  ;;  %327 = vst [vmem:[%s531_s16 + $0x68] sm:$0xff] %v187_v40 }
  0xa0   : > { %v202_v41 = vpop.permute.xlu1 %201  ;;  %v197_v42 = vpop.permute.xlu0 %196 }
  0xa1   : > { %332 = vst [vmem:[%s531_s16 + $0x90] sm:$0xff] %v202_v41  ;;  %333 = vst [vmem:[%s531_s16 + $0x98] sm:$0xff] %v202_v41 }
  0xa2   : > { %330 = vst [vmem:[%s531_s16 + $0x80] sm:$0xff] %v197_v42  ;;  %331 = vst [vmem:[%s531_s16 + $0x88] sm:$0xff] %v197_v42 }
  0xa4   : > { %v212_v43 = vpop.permute.xlu1 %211  ;;  %v207_v44 = vpop.permute.xlu0 %206 }
  0xa5   : > { %336 = vst [vmem:[%s531_s16 + $0xb0] sm:$0xff] %v212_v43  ;;  %337 = vst [vmem:[%s531_s16 + $0xb8] sm:$0xff] %v212_v43 }
  0xa6   : > { %334 = vst [vmem:[%s531_s16 + $0xa0] sm:$0xff] %v207_v44  ;;  %335 = vst [vmem:[%s531_s16 + $0xa8] sm:$0xff] %v207_v44 }
  0xa8   : > { %v222_v45 = vpop.permute.xlu1 %221  ;;  %v217_v46 = vpop.permute.xlu0 %216 }
  0xa9   : > { %340 = vst [vmem:[%s531_s16 + $0xd0] sm:$0xff] %v222_v45  ;;  %341 = vst [vmem:[%s531_s16 + $0xd8] sm:$0xff] %v222_v45 }
  0xaa   : > { %338 = vst [vmem:[%s531_s16 + $0xc0] sm:$0xff] %v217_v46  ;;  %339 = vst [vmem:[%s531_s16 + $0xc8] sm:$0xff] %v217_v46 }
  0xac   : > { %v232_v47 = vpop.permute.xlu1 %231  ;;  %v227_v48 = vpop.permute.xlu0 %226 }
  0xad   : > { %344 = vst [vmem:[%s531_s16 + $0xf0] sm:$0xff] %v232_v47  ;;  %345 = vst [vmem:[%s531_s16 + $0xf8] sm:$0xff] %v232_v47 }
  0xae   : > { %342 = vst [vmem:[%s531_s16 + $0xe0] sm:$0xff] %v227_v48  ;;  %343 = vst [vmem:[%s531_s16 + $0xe8] sm:$0xff] %v227_v48 }
  0xb0   : > { %v242_v49 = vpop.permute.xlu1 %241  ;;  %v237_v50 = vpop.permute.xlu0 %236 }
  0xb1   : > { %348 = vst [vmem:[%s531_s16 + $0x110] sm:$0xff] %v242_v49  ;;  %349 = vst [vmem:[%s531_s16 + $0x118] sm:$0xff] %v242_v49 }
  0xb2   : > { %346 = vst [vmem:[%s531_s16 + $0x100] sm:$0xff] %v237_v50  ;;  %347 = vst [vmem:[%s531_s16 + $0x108] sm:$0xff] %v237_v50 }
  0xb4   : > { %v252_v51 = vpop.permute.xlu1 %251  ;;  %v247_v52 = vpop.permute.xlu0 %246 }
  0xb5   : > { %352 = vst [vmem:[%s531_s16 + $0x130] sm:$0xff] %v252_v51  ;;  %353 = vst [vmem:[%s531_s16 + $0x138] sm:$0xff] %v252_v51 }
  0xb6   : > { %350 = vst [vmem:[%s531_s16 + $0x120] sm:$0xff] %v247_v52  ;;  %351 = vst [vmem:[%s531_s16 + $0x128] sm:$0xff] %v247_v52 }
  0xb8   : > { %v262_v53 = vpop.permute.xlu1 %261  ;;  %v257_v54 = vpop.permute.xlu0 %256 }
  0xb9   : > { %356 = vst [vmem:[%s531_s16 + $0x150] sm:$0xff] %v262_v53  ;;  %357 = vst [vmem:[%s531_s16 + $0x158] sm:$0xff] %v262_v53 }
  0xba   : > { %354 = vst [vmem:[%s531_s16 + $0x140] sm:$0xff] %v257_v54  ;;  %355 = vst [vmem:[%s531_s16 + $0x148] sm:$0xff] %v257_v54 }
  0xbc   : > { %v272_v55 = vpop.permute.xlu1 %271  ;;  %v267_v56 = vpop.permute.xlu0 %266 }
  0xbd   : > { %360 = vst [vmem:[%s531_s16 + $0x170] sm:$0xff] %v272_v55  ;;  %361 = vst [vmem:[%s531_s16 + $0x178] sm:$0xff] %v272_v55 }
  0xbe   : > { %358 = vst [vmem:[%s531_s16 + $0x160] sm:$0xff] %v267_v56  ;;  %359 = vst [vmem:[%s531_s16 + $0x168] sm:$0xff] %v267_v56 }
  0xc0   : > { %v282_v57 = vpop.permute.xlu1 %281  ;;  %v277_v58 = vpop.permute.xlu0 %276 }
  0xc1   : > { %364 = vst [vmem:[%s531_s16 + $0x190] sm:$0xff] %v282_v57  ;;  %365 = vst [vmem:[%s531_s16 + $0x198] sm:$0xff] %v282_v57 }
  0xc2   : > { %362 = vst [vmem:[%s531_s16 + $0x180] sm:$0xff] %v277_v58  ;;  %363 = vst [vmem:[%s531_s16 + $0x188] sm:$0xff] %v277_v58 }
  0xc4   : > { %v292_v59 = vpop.permute.xlu1 %291  ;;  %v287_v60 = vpop.permute.xlu0 %286 }
  0xc5   : > { %368 = vst [vmem:[%s531_s16 + $0x1b0] sm:$0xff] %v292_v59  ;;  %369 = vst [vmem:[%s531_s16 + $0x1b8] sm:$0xff] %v292_v59 }
  0xc6   : > { %366 = vst [vmem:[%s531_s16 + $0x1a0] sm:$0xff] %v287_v60  ;;  %367 = vst [vmem:[%s531_s16 + $0x1a8] sm:$0xff] %v287_v60 }
  0xc8   : > { %v302_v61 = vpop.permute.xlu1 %301  ;;  %v297_v62 = vpop.permute.xlu0 %296 }
  0xc9   : > { %372 = vst [vmem:[%s531_s16 + $0x1d0] sm:$0xff] %v302_v61  ;;  %373 = vst [vmem:[%s531_s16 + $0x1d8] sm:$0xff] %v302_v61 }
  0xca   : > { %370 = vst [vmem:[%s531_s16 + $0x1c0] sm:$0xff] %v297_v62  ;;  %371 = vst [vmem:[%s531_s16 + $0x1c8] sm:$0xff] %v297_v62 }
  0xcc   : > { %v312_v63 = vpop.permute.xlu1 %311  ;;  %v307_v0 = vpop.permute.xlu0 %306 }
  0xcd   : > { %376 = vst [vmem:[%s531_s16 + $0x1f0] sm:$0xff] %v312_v63  ;;  %377 = vst [vmem:[%s531_s16 + $0x1f8] sm:$0xff] %v312_v63 }
  0xce   : > { %374 = vst [vmem:[%s531_s16 + $0x1e0] sm:$0xff] %v307_v0  ;;  %375 = vst [vmem:[%s531_s16 + $0x1e8] sm:$0xff] %v307_v0 }
  0xcf PF: > { %s11_s6 = sadd.s32 1, %s466_s6  }
  0xd0   : > { %p8_p4 = scmp.ge.s32.totalorder %s11_s6, 4  }
  0xd2   :  { %10 = sbr.rel (!%p8_p4) target bundleno = 1 (0x1), region = 54 }

</bundles_post_ra>
